<compile_context>
chip_gen: v7x
topology: tpu7x:2x2x1
jax: 0.10.0
libtpu: 0.0.40
codegen_flags: <defaults>
</compile_context>

<pallas_src>
import jax
import jax.numpy as jnp
from jax.experimental import pallas as pl
from jax.experimental.pallas import tpu as pltpu


def _round_up(x, m):
    return ((x + m - 1) // m) * m


def _head_kernel(x_ref, w1_ref, b1_ref, w2_ref, b2_ref,
                 out_ref, outcon_ref, acc_ref):
    """Fused Linear -> ReLU -> Linear -> Softmax with K-reduction over D.

    Grid: (batch tiles ["parallel"], K tiles over D ["arbitrary", last]).
    acc_ref is an f32 (TILE_B, H_PAD) accumulator that lives across K steps.
    """
    k = pl.program_id(1)

    @pl.when(k == 0)
    def _():
        acc_ref[...] = jnp.zeros_like(acc_ref)

    # Partial (TILE_B, TILE_K) @ (TILE_K, H_PAD); operands fed to the MXU in
    # their native dtype (no up-cast), f32 accumulation.
    acc_ref[...] += jnp.dot(x_ref[...], w1_ref[...],
                            preferred_element_type=jnp.float32)

    @pl.when(k == pl.num_programs(1) - 1)
    def _():
        # out_con = x @ W1 + b1 (pre-activation features, returned as-is).
        out_con = acc_ref[...] + b1_ref[...].astype(jnp.float32)
        outcon_ref[...] = out_con.astype(outcon_ref.dtype)

        # h = relu(out_con); logits = h @ W2 + b2
        h = jnp.maximum(out_con, 0.0)
        logits = jnp.dot(h.astype(w2_ref.dtype), w2_ref[...],
                         preferred_element_type=jnp.float32)
        logits = logits + b2_ref[...].astype(jnp.float32)
        # Padded label lanes carry a -1e30 bias -> exp underflows to 0, so the
        # softmax over the padded width equals the softmax over the true width.
        m = jnp.max(logits, axis=1, keepdims=True)
        e = jnp.exp(logits - m)
        denom = jnp.sum(e, axis=1, keepdims=True)
        probs = e * pl.reciprocal(denom, approx=True)   # EUP slot, ~free
        out_ref[...] = probs.astype(out_ref.dtype)


def space_thinking_head(x, w1, b1, w2, b2, *, tile_b=None, tile_k=None):
    """Fused head of space_thinking_llm.

    x  : (B, D) with D = hidden_size * num_generate_tokens
    w1 : (D, 50),  b1 : (1, 50) or (50,)
    w2 : (50, L),  b2 : (1, L)  or (L,)
    returns (out, out_con): (B, L) softmax probs, (B, 50) pre-ReLU features.
    """
    B, D = x.shape
    H = w1.shape[1]          # 50
    L = w2.shape[1]          # num_labels

    # Lane-dense padded widths (multiples of 128 -> unmasked full-width vst).
    H_PAD = _round_up(H, 128)
    L_PAD = _round_up(L, 128)

    # Tile sizes: batch tile multiple of 8 (sublanes), K tile multiple of 128
    # (lanes).  Kept small enough to double-buffer comfortably inside v7x's
    # 64 MiB VMEM even at production D.
    if tile_b is None:
        tile_b = min(_round_up(B, 8), 256)
    if tile_k is None:
        tile_k = min(_round_up(D, 128), 512)

    B_pad = _round_up(B, tile_b)
    D_pad = _round_up(D, tile_k)

    # Zero-pad operands; padded W1 columns / b1 lanes are zero so padded
    # hidden lanes stay 0 through the ReLU and are killed by zero W2 rows.
    xp = jnp.zeros((B_pad, D_pad), x.dtype).at[:B, :D].set(x)
    w1p = jnp.zeros((D_pad, H_PAD), w1.dtype).at[:D, :H].set(w1)
    b1p = jnp.zeros((1, H_PAD), jnp.float32).at[:, :H].set(
        jnp.reshape(b1, (1, H)).astype(jnp.float32))
    w2p = jnp.zeros((H_PAD, L_PAD), w2.dtype).at[:H, :L].set(w2)
    # Padded label lanes get a huge negative bias -> exp() == 0 in the softmax.
    b2p = jnp.full((1, L_PAD), -1e30, jnp.float32).at[:, :L].set(
        jnp.reshape(b2, (1, L)).astype(jnp.float32))

    grid = (B_pad // tile_b, D_pad // tile_k)

    out_pad, outcon_pad = pl.pallas_call(
        _head_kernel,
        out_shape=(
            jax.ShapeDtypeStruct((B_pad, L_PAD), jnp.float32),  # softmax probs
            jax.ShapeDtypeStruct((B_pad, H_PAD), jnp.float32),  # out_con
        ),
        grid_spec=pltpu.PrefetchScalarGridSpec(
            num_scalar_prefetch=0,
            grid=grid,
            in_specs=[
                pl.BlockSpec((tile_b, tile_k), lambda b, k: (b, k)),   # x
                pl.BlockSpec((tile_k, H_PAD), lambda b, k: (k, 0)),    # W1
                pl.BlockSpec((1, H_PAD), lambda b, k: (0, 0)),         # b1
                pl.BlockSpec((H_PAD, L_PAD), lambda b, k: (0, 0)),     # W2
                pl.BlockSpec((1, L_PAD), lambda b, k: (0, 0)),         # b2
            ],
            out_specs=(
                pl.BlockSpec((tile_b, L_PAD), lambda b, k: (b, 0)),    # out
                pl.BlockSpec((tile_b, H_PAD), lambda b, k: (b, 0)),    # out_con
            ),
            scratch_shapes=[pltpu.VMEM((tile_b, H_PAD), jnp.float32)],
        ),
        compiler_params=pltpu.CompilerParams(
            dimension_semantics=("parallel", "arbitrary"),
            vmem_limit_bytes=64 * 1024 * 1024,
        ),
    )(xp, w1p, b1p, w2p, b2p)

    return out_pad[:B, :L], outcon_pad[:B, :H]


def _init_linear(key, fan_in, fan_out):
    """Deterministic PyTorch-style uniform(-1/sqrt(fan_in), 1/sqrt(fan_in)) init."""
    kw, kb = jax.random.split(key)
    bound = 1.0 / jnp.sqrt(float(fan_in))
    w = jax.random.uniform(kw, (fan_in, fan_out), jnp.float32, -bound, bound)
    b = jax.random.uniform(kb, (1, fan_out), jnp.float32, -bound, bound)
    return w, b


if __name__ == "__main__":
    # Small, forward-consistent shapes:
    #   batch=2, hidden_size=32, num_generate_tokens=2 -> D=64, num_labels=4
    B = 2
    hidden_size = 32
    num_generate_tokens = 2
    D = hidden_size * num_generate_tokens
    HID = 50            # space_thinking_linear output features (hard-coded)
    num_labels = 4

    key = jax.random.PRNGKey(0)
    kx, k1, k2 = jax.random.split(key, 3)

    # Stand-in for aggregated_label_representation (concatenated last-token
    # hidden states from the generated tokens).
    x = jax.random.normal(kx, (B, D), jnp.float32)

    w1, b1 = _init_linear(k1, D, HID)           # space_thinking_linear
    w2, b2 = _init_linear(k2, HID, num_labels)  # space_thinking_linear_2

    out, out_con = space_thinking_head(x, w1, b1, w2, b2)
    jax.block_until_ready((out, out_con))

    # Reference check in plain JAX (same math).
    ref_con = x @ w1 + b1
    ref_out = jax.nn.softmax(jnp.maximum(ref_con, 0.0) @ w2 + b2, axis=1)

    assert out.shape == (B, num_labels) and out_con.shape == (B, HID)
    assert jnp.allclose(out_con, ref_con, atol=1e-4), "out_con mismatch"
    # approx reciprocal -> ~1e-3 relative tolerance on the probabilities.
    assert jnp.allclose(out, ref_out, atol=2e-3), "softmax output mismatch"
    assert jnp.allclose(jnp.sum(out, axis=1), 1.0, atol=2e-3)

    print("KERNEL_OK")
</pallas_src>

<mosaic_0001>
module attributes {stable_mosaic.version = 11 : i64} {
  func.func @_head_kernel(%arg0: i32, %arg1: i32, %arg2: memref<8x128xf32, #tpu.memory_space<vmem>>, %arg3: memref<128x128xf32, #tpu.memory_space<vmem>>, %arg4: memref<1x128xf32, #tpu.memory_space<vmem>>, %arg5: memref<128x128xf32, #tpu.memory_space<vmem>>, %arg6: memref<1x128xf32, #tpu.memory_space<vmem>>, %arg7: memref<8x128xf32, #tpu.memory_space<vmem>>, %arg8: memref<8x128xf32, #tpu.memory_space<vmem>>, %arg9: memref<8x128xf32, #tpu.memory_space<vmem>>) attributes {dimension_semantics = [#tpu.dimension_semantics<parallel>, #tpu.dimension_semantics<arbitrary>], iteration_bounds = array<i64: 1, 1>, scalar_prefetch = 0 : i64, scratch_operands = 1 : i64, tpu.core_type = #tpu.core_type<tc>, window_params = [{transform_indices = @transform_0, window_bounds = array<i64: 8, 128>}, {transform_indices = @transform_1, window_bounds = array<i64: 128, 128>}, {pipeline_mode = #tpu.pipeline_mode<synchronous>, transform_indices = @transform_2, window_bounds = array<i64: 1, 128>}, {pipeline_mode = #tpu.pipeline_mode<synchronous>, transform_indices = @transform_3, window_bounds = array<i64: 128, 128>}, {pipeline_mode = #tpu.pipeline_mode<synchronous>, transform_indices = @transform_4, window_bounds = array<i64: 1, 128>}, {transform_indices = @transform_5, window_bounds = array<i64: 8, 128>}, {transform_indices = @transform_6, window_bounds = array<i64: 8, 128>}]} {
    %c0_i32 = arith.constant 0 : i32
    %0 = arith.cmpi eq, %arg1, %c0_i32 : i32
    %1 = arith.extui %0 : i1 to i32
    %c0_i32_0 = arith.constant 0 : i32
    %2 = arith.cmpi ne, %1, %c0_i32_0 : i32
    scf.if %2 {
      %cst_10 = arith.constant 0.000000e+00 : f32
      %12 = vector.broadcast %cst_10 : f32 to vector<8x128xf32>
      %c0_11 = arith.constant 0 : index
      %c0_12 = arith.constant 0 : index
      %13 = vector.load %arg9[%c0_11, %c0_12] : memref<8x128xf32, #tpu.memory_space<vmem>>, vector<8x128xf32>
      tpu.vector_store %arg9[%c0_11, %c0_12], %12 {strides = array<i32>} : memref<8x128xf32, #tpu.memory_space<vmem>>, vector<8x128xf32>,
    } else {
    }
    %c0 = arith.constant 0 : index
    %c0_1 = arith.constant 0 : index
    %3 = vector.load %arg9[%c0, %c0_1] : memref<8x128xf32, #tpu.memory_space<vmem>>, vector<8x128xf32>
    %c0_2 = arith.constant 0 : index
    %c0_3 = arith.constant 0 : index
    %4 = vector.load %arg2[%c0_2, %c0_3] : memref<8x128xf32, #tpu.memory_space<vmem>>, vector<8x128xf32>
    %c0_4 = arith.constant 0 : index
    %c0_5 = arith.constant 0 : index
    %5 = vector.load %arg3[%c0_4, %c0_5] : memref<128x128xf32, #tpu.memory_space<vmem>>, vector<128x128xf32>
    %cst = arith.constant dense<0.000000e+00> : vector<8x128xf32>
    %6 = tpu.matmul %4, %5, %cst {dimension_numbers = #tpu.dot_dimension_numbers<[1], [0], [0], [1], [0, 0, 1, 1], [], []>} : vector<8x128xf32>, vector<128x128xf32>, vector<8x128xf32> -> vector<8x128xf32>
    %7 = arith.addf %3, %6 : vector<8x128xf32>
    %c0_6 = arith.constant 0 : index
    %c0_7 = arith.constant 0 : index
    %8 = vector.load %arg9[%c0_6, %c0_7] : memref<8x128xf32, #tpu.memory_space<vmem>>, vector<8x128xf32>
    tpu.vector_store %arg9[%c0_6, %c0_7], %7 {strides = array<i32>} : memref<8x128xf32, #tpu.memory_space<vmem>>, vector<8x128xf32>,
    %c0_i32_8 = arith.constant 0 : i32
    %9 = arith.cmpi eq, %arg1, %c0_i32_8 : i32
    %10 = arith.extui %9 : i1 to i32
    %c0_i32_9 = arith.constant 0 : i32
    %11 = arith.cmpi ne, %10, %c0_i32_9 : i32
    scf.if %11 {
      %c0_10 = arith.constant 0 : index
      %c0_11 = arith.constant 0 : index
      %12 = vector.load %arg9[%c0_10, %c0_11] : memref<8x128xf32, #tpu.memory_space<vmem>>, vector<8x128xf32>
      %c0_12 = arith.constant 0 : index
      %c0_13 = arith.constant 0 : index
      %13 = vector.load %arg4[%c0_12, %c0_13] : memref<1x128xf32, #tpu.memory_space<vmem>>, vector<1x128xf32>
      %14 = vector.broadcast %13 : vector<1x128xf32> to vector<8x128xf32>
      %15 = arith.addf %12, %14 : vector<8x128xf32>
      %c0_14 = arith.constant 0 : index
      %c0_15 = arith.constant 0 : index
      %16 = vector.load %arg8[%c0_14, %c0_15] : memref<8x128xf32, #tpu.memory_space<vmem>>, vector<8x128xf32>
      tpu.vector_store %arg8[%c0_14, %c0_15], %15 {strides = array<i32>} : memref<8x128xf32, #tpu.memory_space<vmem>>, vector<8x128xf32>,
      %cst_16 = arith.constant 0.000000e+00 : f32
      %17 = vector.broadcast %cst_16 : f32 to vector<8x128xf32>
      %18 = arith.maximumf %15, %17 : vector<8x128xf32>
      %c0_17 = arith.constant 0 : index
      %c0_18 = arith.constant 0 : index
      %19 = vector.load %arg5[%c0_17, %c0_18] : memref<128x128xf32, #tpu.memory_space<vmem>>, vector<128x128xf32>
      %cst_19 = arith.constant dense<0.000000e+00> : vector<8x128xf32>
      %20 = tpu.matmul %18, %19, %cst_19 {dimension_numbers = #tpu.dot_dimension_numbers<[1], [0], [0], [1], [0, 0, 1, 1], [], []>} : vector<8x128xf32>, vector<128x128xf32>, vector<8x128xf32> -> vector<8x128xf32>
      %c0_20 = arith.constant 0 : index
      %c0_21 = arith.constant 0 : index
      %21 = vector.load %arg6[%c0_20, %c0_21] : memref<1x128xf32, #tpu.memory_space<vmem>>, vector<1x128xf32>
      %22 = vector.broadcast %21 : vector<1x128xf32> to vector<8x128xf32>
      %23 = arith.addf %20, %22 : vector<8x128xf32>
      %cst_22 = arith.constant dense<0xFF800000> : vector<8xf32>
      %24 = vector.multi_reduction <maximumf>, %23, %cst_22 [1] : vector<8x128xf32> to vector<8xf32>
      %25 = vector.shape_cast %24 : vector<8xf32> to vector<8x1xf32>
      %26 = vector.broadcast %25 : vector<8x1xf32> to vector<8x128xf32>
      %27 = arith.subf %23, %26 : vector<8x128xf32>
      %28 = math.exp %27 : vector<8x128xf32>
      %cst_23 = arith.constant dense<0.000000e+00> : vector<8xf32>
      %29 = vector.multi_reduction <add>, %28, %cst_23 [1] : vector<8x128xf32> to vector<8xf32>
      %30 = vector.shape_cast %29 : vector<8xf32> to vector<8x1xf32>
      %31 = tpu.reciprocal %30 {approx = true} : vector<8x1xf32> -> vector<8x1xf32>
      %32 = vector.broadcast %31 : vector<8x1xf32> to vector<8x128xf32>
      %33 = arith.mulf %28, %32 : vector<8x128xf32>
      %c0_24 = arith.constant 0 : index
      %c0_25 = arith.constant 0 : index
      %34 = vector.load %arg7[%c0_24, %c0_25] : memref<8x128xf32, #tpu.memory_space<vmem>>, vector<8x128xf32>
      tpu.vector_store %arg7[%c0_24, %c0_25], %33 {strides = array<i32>} : memref<8x128xf32, #tpu.memory_space<vmem>>, vector<8x128xf32>,
    } else {
    }
    return
  }
  func.func @transform_0(%arg0: i32, %arg1: i32) -> (i32, i32) {
    %c0_i32 = arith.constant 0 : i32
    return %arg0, %arg1 : i32, i32
  }
  func.func @transform_1(%arg0: i32, %arg1: i32) -> (i32, i32) {
    %c0_i32 = arith.constant 0 : i32
    %c0_i32_0 = arith.constant 0 : i32
    return %arg1, %c0_i32 : i32, i32
  }
  func.func @transform_2(%arg0: i32, %arg1: i32) -> (i32, i32) {
    %c0_i32 = arith.constant 0 : i32
    %c0_i32_0 = arith.constant 0 : i32
    %c0_i32_1 = arith.constant 0 : i32
    return %c0_i32, %c0_i32_0 : i32, i32
  }
  func.func @transform_3(%arg0: i32, %arg1: i32) -> (i32, i32) {
    %c0_i32 = arith.constant 0 : i32
    %c0_i32_0 = arith.constant 0 : i32
    %c0_i32_1 = arith.constant 0 : i32
    return %c0_i32, %c0_i32_0 : i32, i32
  }
  func.func @transform_4(%arg0: i32, %arg1: i32) -> (i32, i32) {
    %c0_i32 = arith.constant 0 : i32
    %c0_i32_0 = arith.constant 0 : i32
    %c0_i32_1 = arith.constant 0 : i32
    return %c0_i32, %c0_i32_0 : i32, i32
  }
  func.func @transform_5(%arg0: i32, %arg1: i32) -> (i32, i32) {
    %c0_i32 = arith.constant 0 : i32
    %c0_i32_0 = arith.constant 0 : i32
    return %arg0, %c0_i32 : i32, i32
  }
  func.func @transform_6(%arg0: i32, %arg1: i32) -> (i32, i32) {
    %c0_i32 = arith.constant 0 : i32
    %c0_i32_0 = arith.constant 0 : i32
    return %arg0, %c0_i32 : i32, i32
  }
}

</mosaic_0001>

<bundles_post_ra>
// kernel: tpu_custom_call.1
= control target key start
LH: loop header
LB: loop body
LE: loop exit
PB: predicated region body
PF: predicated region fallthrough
CT: control target
= control target key end

     0   :  { %12 = vsyncpa [#allocation4], 0  ;;  %s810_s0 = inlined_call_operand.hbm [shape: f32[8,128], index: 0, kind: input, shape index: {}]   ;;  %s811_s1 = inlined_call_operand.hbm [shape: f32[128,128], index: 1, kind: input, shape index: {}]   ;;  %s812_s2 = inlined_call_operand.hbm [shape: f32[1,128], index: 2, kind: input, shape index: {}]   ;;  %s813_s3 = inlined_call_operand.hbm [shape: f32[128,128], index: 3, kind: input, shape index: {}]   ;;  %s814_s4 = inlined_call_operand.hbm [shape: f32[1,128], index: 4, kind: input, shape index: {}]   ;;  %s815_s5 = inlined_call_operand.hbm [shape: f32[8,128], index: 5, kind: output, shape index: {0}]   ;;  %s816_s6 = inlined_call_operand.hbm [shape: f32[8,128], index: 6, kind: output, shape index: {1}]  }
   0x1   :  { %13 = vsyncpa [#allocation7], 0 }
   0x2   :  { %14 = vsyncpa [#allocation10], 0 }
   0x3   :  { %15 = vsyncpa [#allocation5], 0 }
   0x4   :  { %16 = vsyncpa [#allocation14], 0  ;;  %s663_s21 = smov [#allocation6]   ;;  %s499_s25 = scalar_lea.hbm %s811_s1, 2048 }
   0x5   :  { %s32_s22 = sshll.u32 %s663_s21, 4  ;;  %p500_p0 = scmp.ne.s32.totalorder %s811_s1, %s499_s25  ;;  %s33_s22 = int_to_ptr.vmem [resolvable:$true] %s32_s22 }
   0x6   :  { %p503_p1 = scmp.lt.u32.totalorder %s499_s25, %s811_s1 }
   0x8   :  { %p505_p2 = pnand %p503_p1, %p500_p0 }
   0xa   :  { %508 = shalt.err (!%p505_p2)
}
   0xb   :  { %s509_s30 = scalar_lea.vmem %s33_s22, 2048  ;;  %p514_p4 = scmp.lt.s32.totalorder %s33_s22, %s33_s22 }
   0xc   :  { %p510_p3 = scmp.ne.s32.totalorder %s33_s22, %s509_s30  ;;  %p515_p5 = scmp.lt.s32.totalorder %s509_s30, %s509_s30 }
   0xe   :  { %p516_p6 = por %p515_p5, %p514_p4 }
  0x10   :  { %p517_p7 = pnand %p516_p6, %p510_p3 }
  0x12   :  { %520 = shalt.err (!%p517_p7)
}
  0x13   :  { %s664_s7 = smov 128   ;;  %s665_s8 = smov 8  }
  0x14   :  { %38 = dma.hbm_to_vmem [thread:$0]  %s811_s1, 2048, %s33_s22, [#allocation7], %s664_s7, %s664_s7, %s665_s8  }
  0x15   :  { %s666_s11 = smov [#allocation9]   ;;  %s667_s13 = smov [#allocation3]  }
  0x16   :  { %s54_s12 = sshll.u32 %s666_s11, 4  ;;  %s23_s14 = sshll.u32 %s667_s13, 4  ;;  %s55_s12 = int_to_ptr.vmem [resolvable:$true] %s54_s12  ;;  %s24_s14 = int_to_ptr.vmem [resolvable:$true] %s23_s14 }
  0x17   :  { %s521_s17 = scalar_lea.hbm %s813_s3, 2048 }
  0x18   :  { %p522_p8 = scmp.ne.s32.totalorder %s813_s3, %s521_s17  ;;  %p525_p9 = scmp.lt.u32.totalorder %s521_s17, %s813_s3 }
  0x1a   :  { %p527_p10 = pnand %p525_p9, %p522_p8 }
  0x1c   :  { %530 = shalt.err (!%p527_p10)
}
  0x1d   :  { %s531_s1 = scalar_lea.vmem %s55_s12, 2048  ;;  %p536_p12 = scmp.lt.s32.totalorder %s55_s12, %s55_s12 }
  0x1e   :  { %p532_p11 = scmp.ne.s32.totalorder %s55_s12, %s531_s1  ;;  %p537_p13 = scmp.lt.s32.totalorder %s531_s1, %s531_s1 }
  0x20   :  { %p538_p0 = por %p537_p13, %p536_p12 }
  0x22   :  { %p539_p1 = pnand %p538_p0, %p532_p11 }
  0x24   :  { %542 = shalt.err (!%p539_p1)
}
  0x25   :  { %60 = dma.hbm_to_vmem [thread:$0]  %s813_s3, 2048, %s55_s12, [#allocation10], %s664_s7, %s664_s7, %s665_s8  }
  0x26   :  { %s543_s26 = scalar_lea.hbm %s810_s0, 128 }
  0x27   :  { %p544_p2 = scmp.ne.s32.totalorder %s810_s0, %s543_s26  ;;  %p547_p3 = scmp.lt.u32.totalorder %s543_s26, %s810_s0 }
  0x29   :  { %p549_p4 = pnand %p547_p3, %p544_p2 }
  0x2b   :  { %552 = shalt.err (!%p549_p4)
}
  0x2c   :  { %s553_s9 = scalar_lea.vmem %s24_s14, 128  ;;  %p558_p6 = scmp.lt.s32.totalorder %s24_s14, %s24_s14 }
  0x2d   :  { %p554_p5 = scmp.ne.s32.totalorder %s24_s14, %s553_s9  ;;  %p559_p7 = scmp.lt.s32.totalorder %s553_s9, %s553_s9 }
  0x2f   :  { %p560_p8 = por %p559_p7, %p558_p6 }
  0x31   :  { %p561_p9 = pnand %p560_p8, %p554_p5 }
  0x33   :  { %564 = shalt.err (!%p561_p9)
}
  0x34   :  { %26 = dma.hbm_to_vmem [thread:$0]  %s810_s0, 128, %s24_s14, [#allocation4]  }
  0x35   :  { %s668_s8 = smov [#allocation8]   ;;  %s669_s11 = smov [#allocation11]  }
  0x36   :  { %s45_s10 = sshll.u32 %s668_s8, 4  ;;  %s67_s12 = sshll.u32 %s669_s11, 4  ;;  %s46_s10 = int_to_ptr.vmem [resolvable:$true] %s45_s10  ;;  %s68_s12 = int_to_ptr.vmem [resolvable:$true] %s67_s12 }
  0x37   :  { %s565_s16 = scalar_lea.hbm %s812_s2, 16 }
  0x38   :  { %p566_p10 = scmp.ne.s32.totalorder %s812_s2, %s565_s16  ;;  %p569_p11 = scmp.lt.u32.totalorder %s565_s16, %s812_s2 }
  0x3a   :  { %p571_p12 = pnand %p569_p11, %p566_p10 }
  0x3c   :  { %574 = shalt.err (!%p571_p12)
}
  0x3d   :  { %s575_s0 = scalar_lea.vmem %s46_s10, 16  ;;  %s579_s14 = scalar_lea.vmem %s46_s10, 32 }
  0x3e   :  { %p576_p13 = scmp.ne.s32.totalorder %s46_s10, %s575_s0  ;;  %p580_p0 = scmp.lt.s32.totalorder %s46_s10, %s46_s10 }
  0x3f   :  { %p581_p1 = scmp.lt.s32.totalorder %s579_s14, %s575_s0 }
  0x41   :  { %p582_p2 = por %p581_p1, %p580_p0 }
  0x43   :  { %p583_p3 = pnand %p582_p2, %p576_p13 }
  0x45   :  { %586 = shalt.err (!%p583_p3)
}
  0x46   :  { %48 = dma.hbm_to_vmem [thread:$0]  %s812_s2, 16, %s46_s10, [#allocation7]  }
  0x47   :  { %s587_s24 = scalar_lea.hbm %s814_s4, 16 }
  0x48   :  { %p588_p4 = scmp.ne.s32.totalorder %s814_s4, %s587_s24  ;;  %p591_p5 = scmp.lt.u32.totalorder %s587_s24, %s814_s4 }
  0x4a   :  { %p593_p6 = pnand %p591_p5, %p588_p4 }
  0x4c   :  { %596 = shalt.err (!%p593_p6)
}
  0x4d   :  { %s597_s29 = scalar_lea.vmem %s68_s12, 16  ;;  %s601_s30 = scalar_lea.vmem %s68_s12, 32 }
  0x4e   :  { %p598_p7 = scmp.ne.s32.totalorder %s68_s12, %s597_s29  ;;  %p602_p8 = scmp.lt.s32.totalorder %s68_s12, %s68_s12 }
  0x4f   :  { %p603_p9 = scmp.lt.s32.totalorder %s601_s30, %s597_s29 }
  0x51   :  { %p604_p10 = por %p603_p9, %p602_p8 }
  0x53   :  { %p605_p11 = pnand %p604_p10, %p598_p7 }
  0x55   :  { %608 = shalt.err (!%p605_p11)
}
  0x56   :  { %70 = dma.hbm_to_vmem [thread:$0]  %s814_s4, 16, %s68_s12, [#allocation10]  }
  0x57   :  { %653 = dma.done.wait [#allocation4], 128  }
  0x58   :  { %654 = vsyncadd [#allocation4], 4294967168 }
  0x59   :  { %655 = dma.done.wait [#allocation7], 2064  }
  0x5a   :  { %656 = vsyncadd [#allocation7], 4294965232 }
  0x5b   :  { %657 = dma.done.wait [#allocation10], 2064  }
  0x5c   :  { %658 = vsyncadd [#allocation10], 4294965232  ;;  %v670_v0 = vmov 0.0|0.0   ;;  %vm671_vm0 = vmmov 0   ;;  %v672_v1 = vmov 0.0   ;;  %v93_v2 = vld [vmem:[#allocation6] sm:$0xff] }
  0x5d   :  { %435 = vmatprep.subr.bf16.mxu0 %v670_v0  ;;  %397 = vmatprep.mubr.msk.f32.mxu0 %vm671_vm0, %v672_v1  ;;  %v94_v3 = vld [vmem:[#allocation6 + $0x8] sm:$0xff]  ;;  %v95_v4 = vld [vmem:[#allocation6 + $0x10] sm:$0xff]  ;;  %v96_v6 = vld [vmem:[#allocation6 + $0x18] sm:$0xff]  ;;  %s673_s4 = smov [#allocation13]  }
  0x5e   :  { %459 = vmatprep.subr.bf16.mxu1 %v670_v0  ;;  %432 = vmatprep.mubr.msk.f32.mxu1 %vm671_vm0, %v672_v1  ;;  %v436_v5 = vpack.c.bf16 %v94_v3, %v93_v2  ;;  %v439_v7 = vpack.c.bf16 %v96_v6, %v95_v4  ;;  %v97_v8 = vld [vmem:[#allocation6 + $0x20] sm:$0xff]  ;;  %v98_v9 = vld [vmem:[#allocation6 + $0x28] sm:$0xff]  ;;  %v197_v12 = vld [vmem:[#allocation9 + $0x10] sm:$0xff]  ;;  %s314_s3 = sshll.u32 %s673_s4, 4  ;;  %s315_s3 = int_to_ptr.vmem [resolvable:$true] %s314_s3 }
  0x5f   :  { %v195_v10 = vld [vmem:[#allocation9] sm:$0xff]  ;;  %v196_v11 = vld [vmem:[#allocation9 + $0x8] sm:$0xff]  ;;  %v198_v13 = vld [vmem:[#allocation9 + $0x18] sm:$0xff]  ;;  %v442_v14 = vpack.c.bf16 %v98_v9, %v97_v8  ;;  %s609_s7 = scalar_lea.vmem %s315_s3, 128  ;;  %p614_p13 = scmp.lt.s32.totalorder %s315_s3, %s315_s3 }
  0x60   :  { %437 = vmatpush3.bf16.msra.mxu0 %v436_v5  ;;  %v460_v15 = vpack.c.bf16 %v196_v11, %v195_v10  ;;  %v99_v16 = vld [vmem:[#allocation6 + $0x30] sm:$0xff]  ;;  %v100_v17 = vld [vmem:[#allocation6 + $0x38] sm:$0xff]  ;;  %v463_v18 = vpack.c.bf16 %v198_v13, %v197_v12  ;;  %v199_v19 = vld [vmem:[#allocation9 + $0x20] sm:$0xff]  ;;  %p610_p12 = scmp.ne.s32.totalorder %s315_s3, %s609_s7  ;;  %p615_p0 = scmp.lt.s32.totalorder %s609_s7, %s609_s7 }
  0x61   :  { %438 = vmatprep.subr.bf16.mxu0 %v670_v0  ;;  %v200_v20 = vld [vmem:[#allocation9 + $0x28] sm:$0xff]  ;;  %v445_v21 = vpack.c.bf16 %v100_v17, %v99_v16  ;;  %v101_v22 = vld [vmem:[#allocation6 + $0x40] sm:$0xff]  ;;  %v201_v25 = vld [vmem:[#allocation9 + $0x30] sm:$0xff] }
  0x62   :  { %461 = vmatpush3.bf16.msra.mxu1 %v460_v15  ;;  %v102_v23 = vld [vmem:[#allocation6 + $0x48] sm:$0xff]  ;;  %v466_v24 = vpack.c.bf16 %v200_v20, %v199_v19  ;;  %v202_v26 = vld [vmem:[#allocation9 + $0x38] sm:$0xff]  ;;  %v103_v28 = vld [vmem:[#allocation6 + $0x50] sm:$0xff]  ;;  %p616_p1 = por %p615_p0, %p614_p13 }
  0x63   :  { %462 = vmatprep.subr.bf16.mxu1 %v670_v0  ;;  %v448_v27 = vpack.c.bf16 %v102_v23, %v101_v22  ;;  %v104_v29 = vld [vmem:[#allocation6 + $0x58] sm:$0xff]  ;;  %v469_v30 = vpack.c.bf16 %v202_v26, %v201_v25  ;;  %v203_v31 = vld [vmem:[#allocation9 + $0x40] sm:$0xff]  ;;  %v204_v32 = vld [vmem:[#allocation9 + $0x48] sm:$0xff] }
  0x64   :  { %440 = vmatpush3.bf16.msra.mxu0 %v439_v7  ;;  %v451_v33 = vpack.c.bf16 %v104_v29, %v103_v28  ;;  %v105_v34 = vld [vmem:[#allocation6 + $0x60] sm:$0xff]  ;;  %v106_v35 = vld [vmem:[#allocation6 + $0x68] sm:$0xff]  ;;  %v472_v36 = vpack.c.bf16 %v204_v32, %v203_v31  ;;  %v205_v37 = vld [vmem:[#allocation9 + $0x50] sm:$0xff]  ;;  %p617_p2 = pnand %p616_p1, %p610_p12 }
  0x65   :  { %441 = vmatprep.subr.bf16.mxu0 %v670_v0  ;;  %v206_v38 = vld [vmem:[#allocation9 + $0x58] sm:$0xff]  ;;  %v454_v39 = vpack.c.bf16 %v106_v35, %v105_v34  ;;  %v107_v40 = vld [vmem:[#allocation6 + $0x70] sm:$0xff]  ;;  %v207_v43 = vld [vmem:[#allocation9 + $0x60] sm:$0xff] }
  0x66   :  { %464 = vmatpush3.bf16.msra.mxu1 %v463_v18  ;;  %v108_v41 = vld [vmem:[#allocation6 + $0x78] sm:$0xff]  ;;  %v475_v42 = vpack.c.bf16 %v206_v38, %v205_v37  ;;  %v208_v44 = vld [vmem:[#allocation9 + $0x68] sm:$0xff]  ;;  %v329_v51 = vld [vmem:[#allocation8] ss:$0 sm:$0xff] }
  0x67   :  { %465 = vmatprep.subr.bf16.mxu1 %v670_v0  ;;  %v457_v45 = vpack.c.bf16 %v108_v41, %v107_v40  ;;  %v478_v46 = vpack.c.bf16 %v208_v44, %v207_v43  ;;  %v92_v47 = vld [vmem:[#allocation3] sm:$0xff]  ;;  %v330_v56 = vld [vmem:[#allocation11] ss:$0 sm:$0xff] }
  0x68   :  { %443 = vmatpush3.bf16.msra.mxu0 %v442_v14  ;;  %v209_v48 = vld [vmem:[#allocation9 + $0x70] sm:$0xff]  ;;  %v210_v49 = vld [vmem:[#allocation9 + $0x78] sm:$0xff] }
  0x69   :  { %444 = vmatprep.subr.bf16.mxu0 %v670_v0  ;;  %v481_v50 = vpack.c.bf16 %v210_v49, %v209_v48 }
  0x6a   :  { %467 = vmatpush3.bf16.msra.mxu1 %v466_v24 }
  0x6b   :  { %468 = vmatprep.subr.bf16.mxu1 %v670_v0 }
  0x6c   :  { %446 = vmatpush3.bf16.msra.mxu0 %v445_v21 }
  0x6d   :  { %447 = vmatprep.subr.bf16.mxu0 %v670_v0 }
  0x6e   :  { %470 = vmatpush3.bf16.msra.mxu1 %v469_v30 }
  0x6f   :  { %471 = vmatprep.subr.bf16.mxu1 %v670_v0 }
  0x70   :  { %449 = vmatpush3.bf16.msra.mxu0 %v448_v27 }
  0x71   :  { %450 = vmatprep.subr.bf16.mxu0 %v670_v0 }
  0x72   :  { %473 = vmatpush3.bf16.msra.mxu1 %v472_v36 }
  0x73   :  { %474 = vmatprep.subr.bf16.mxu1 %v670_v0 }
  0x74   :  { %452 = vmatpush3.bf16.msra.mxu0 %v451_v33 }
  0x75   :  { %453 = vmatprep.subr.bf16.mxu0 %v670_v0 }
  0x76   :  { %476 = vmatpush3.bf16.msra.mxu1 %v475_v42 }
  0x77   :  { %477 = vmatprep.subr.bf16.mxu1 %v670_v0 }
  0x78   :  { %455 = vmatpush3.bf16.msra.mxu0 %v454_v39 }
  0x79   :  { %456 = vmatprep.subr.bf16.mxu0 %v670_v0 }
  0x7a   :  { %479 = vmatpush3.bf16.msra.mxu1 %v478_v46 }
  0x7b   :  { %480 = vmatprep.subr.bf16.mxu1 %v670_v0 }
  0x7c   :  { %458 = vmatpush3.bf16.msra.mxu0 %v457_v45 }
  0x7e   :  { %482 = vmatpush3.bf16.msra.mxu1 %v481_v50 }
  0x7f   :  { %398 = vmatmul.mubr.f32.vlgmr.msra.gmra.mrb[0].mxu0 %v92_v47 }
 0x152   :  { %v175_v52 = vpop.f32.mrb[0].mxu0 }
 0x153   :  { %v192_v53 = vadd.f32 %v329_v51, %v175_v52  ;;  %v399_v54 = vpop.f32.mrb[1].mxu0 }
 0x155   :  { %v194_v55 = vmax.f32 %v192_v53, 0.0  ;;  %193 = vst [vmem:[#allocation13] sm:$0xff] %v192_v53 }
 0x157   :  { %433 = vmatmul.mubr.f32.vlgmr.msra.gmra.mrb[0].mxu1 %v194_v55 }
 0x22a   :  { %v284_v57 = vpop.f32.mrb[0].mxu1 }
 0x22b   :  { %v285_v58 = vadd.f32 %v330_v56, %v284_v57  ;;  %v434_v59 = vpop.f32.mrb[1].mxu1 }
 0x22d   :  { %288 = vmax.xlane.f32.xlu0 %v285_v58 }
 0x2ba   :  { %v289_v60 = vpop.xlane.xlu0 %288 }
 0x2bb   :  { %v290_v61 = vsub.f32 %v285_v58, %v289_v60 }
 0x2bd   :  { %v291_v62 = vmul.f32 1.442695, %v290_v61 }
 0x2bf   :  { %495 = vpow2.f32 %v291_v62 }
 0x2c9   :  { %v496_v63 = vpop.eup %495 }
 0x2ca   :  { %293 = vadd.xlane.f32.xlu0 %v496_v63 }
 0x2cb   :  { %620 = shalt.err (!%p617_p2)
}
 0x2cc   :  { %s621_s11 = scalar_lea.hbm %s816_s6, 128 }
 0x2cd   :  { %p622_p3 = scmp.ne.s32.totalorder %s816_s6, %s621_s11  ;;  %p625_p4 = scmp.lt.u32.totalorder %s621_s11, %s816_s6 }
 0x2cf   :  { %p627_p5 = pnand %p625_p4, %p622_p3 }
 0x2d1   :  { %630 = shalt.err (!%p627_p5)
}
 0x2d2   :  { %317 = dma.vmem_to_hbm [thread:$0]  %s315_s3, 128, %s816_s6, [#allocation14]  }
 0x2d3   :  { %s674_s19 = smov [#allocation12]  }
 0x2d4   :  { %s304_s20 = sshll.u32 %s674_s19, 4  ;;  %s305_s20 = int_to_ptr.vmem [resolvable:$true] %s304_s20 }
 0x2d5   :  { %s631_s0 = scalar_lea.vmem %s305_s20, 128  ;;  %p636_p7 = scmp.lt.s32.totalorder %s305_s20, %s305_s20 }
 0x2d6   :  { %p632_p6 = scmp.ne.s32.totalorder %s305_s20, %s631_s0  ;;  %p637_p8 = scmp.lt.s32.totalorder %s631_s0, %s631_s0 }
 0x2d8   :  { %p638_p9 = por %p637_p8, %p636_p7 }
 0x2da   :  { %p639_p10 = pnand %p638_p9, %p632_p6 }
 0x357   :  { %v294_v0 = vpop.xlane.xlu0 %293 }
 0x358   :  { %497 = vrcp.f32 %v294_v0 }
 0x362   :  { %v498_v1 = vpop.eup %497 }
 0x363   :  { %v296_v2 = vmul.f32 %v498_v1, %v496_v63 }
 0x365   :  { %297 = vst [vmem:[#allocation12] sm:$0xff] %v296_v2 }
 0x366   :  { %642 = shalt.err (!%p639_p10)
}
 0x367   :  { %s643_s1 = scalar_lea.hbm %s815_s5, 128 }
 0x368   :  { %p644_p11 = scmp.ne.s32.totalorder %s815_s5, %s643_s1  ;;  %p647_p12 = scmp.lt.u32.totalorder %s643_s1, %s815_s5 }
 0x36a   :  { %p649_p13 = pnand %p647_p12, %p644_p11 }
 0x36c   :  { %652 = shalt.err (!%p649_p13)
}
 0x36d   :  { %307 = dma.vmem_to_hbm [thread:$0]  %s305_s20, 128, %s815_s5, [#allocation5]  }
 0x36e   :  { %659 = dma.done.wait [#allocation5], 128  }
 0x36f   :  { %660 = vsyncadd [#allocation5], 4294967168 }
 0x370   :  { %661 = dma.done.wait [#allocation14], 128  }
 0x371   :  { %662 = vsyncadd [#allocation14], 4294967168 }
 0x372   :  { %324 = vsyncpa [#allocation4], 1 }
 0x373   :  { %325 = vsyncpa [#allocation7], 1 }
 0x374   :  { %326 = vsyncpa [#allocation10], 1 }
 0x375   :  { %327 = vsyncpa [#allocation5], 1 }
 0x376   :  { %328 = vsyncpa [#allocation14], 1 }

</bundles_post_ra>
